<compile_context>
chip_gen: v6e
topology: v6e:2x2x1
jax: 0.10.0
libtpu: 0.0.40
codegen_flags: <defaults>
</compile_context>

<pallas_src>
import jax
import jax.numpy as jnp
from jax.experimental import pallas as pl
from jax.experimental.pallas import tpu as pltpu


def _round_up(x, m):
    return ((x + m - 1) // m) * m


def _default_vmem_limit_bytes():
    """~56 MiB on v7x (64 MiB physical VMEM), ~112 MiB on v5e/v6e (128 MiB),
    leaving headroom for compiler-internal scratch and the pipelined output."""
    try:
        cap = int(pltpu.get_tpu_info().vmem_capacity_bytes)
    except Exception:
        cap = 64 << 20  # conservative: assume the smallest (v7x) VMEM
    return max(32 << 20, min(cap - (8 << 20), 112 << 20))


def _choose_tb(batch, tb_max):
    """Batch tile: 8-aligned, multiple of 256 for large batches (256x256 MXU),
    split into >=2 tiles when possible so both v7x TensorCores get work,
    while capping batch-padding waste."""
    b8 = _round_up(max(int(batch), 1), 8)
    tb_max = max(256, (int(tb_max) // 256) * 256)
    if b8 <= tb_max:
        if b8 >= 512:
            return _round_up((b8 + 1) // 2, 8)  # two tiles -> megacore
        return b8
    tb = 256
    for cand in range(256, tb_max + 1, 256):
        if _round_up(b8, cand) - b8 <= max(b8 // 8, 256):  # cap padded rows
            tb = cand
    return tb


def _choose_tn(d_model, d_sae, tb, tn_max, in_item, w_item, out_item,
               use_scratch, budget_bytes):
    """d_sae tile from the VMEM budget.  Double-buffered W_enc^T and W_dec
    tiles dominate: 2 weights x 2 buffers x d_model x tn x itemsize."""
    fixed = (2 * tb * d_model * in_item                      # x tile (2 bufs)
             + 2 * tb * d_model * out_item                   # output tile
             + (tb * d_model * 4 if use_scratch else 0)      # f32 accumulator
             + 4 * d_model * 4                               # b_dec tile
             + (1 << 20))                                    # bias/thr + slack
    per_tn = 2 * 2 * d_model * w_item
    tn_fit = max(128, int((budget_bytes - fixed) // per_tn))
    tn = min(tn_fit, int(tn_max), _round_up(d_sae, 128))
    if tn >= 256:
        tn = (tn // 256) * 256
    else:
        tn = 128
    return tn


def _sae_block(x_ref, we_ref, be_ref, thr_ref, wd_ref):
    # Encode against this contiguous row-block of W_enc^T:
    # (tb, d_model) . (tn, d_model)^T -> (tb, tn), f32 accumulation on MXU.
    pre = jax.lax.dot_general(
        x_ref[...], we_ref[...],
        dimension_numbers=(((1,), (1,)), ((), ())),
        preferred_element_type=jnp.float32)
    pre = pre + be_ref[...]
    # JumpReLU with the ReLU folded into the compare (thr holds max(thr, 0)):
    # where(pre > max(thr,0), pre, 0) == (pre > thr) * relu(pre).
    acts = jnp.where(pre > thr_ref[...], pre, jnp.float32(0.0))
    # Partial decode for this d_sae block.
    return jnp.dot(acts.astype(wd_ref.dtype), wd_ref[...],
                   preferred_element_type=jnp.float32)


def _sae_kernel_accum_out(x_ref, we_ref, be_ref, thr_ref, wd_ref, bd_ref,
                          o_ref):
    """f32 output: accumulate directly into the k-resident output block."""
    k = pl.program_id(1)

    @pl.when(k == 0)
    def _():
        o_ref[...] = jnp.zeros_like(o_ref)

    o_ref[...] += _sae_block(x_ref, we_ref, be_ref, thr_ref, wd_ref)

    @pl.when(k == pl.num_programs(1) - 1)
    def _():
        o_ref[...] += bd_ref[...]


def _sae_kernel_scratch(x_ref, we_ref, be_ref, thr_ref, wd_ref, bd_ref,
                        o_ref, acc_ref):
    """Low-precision output: f32 VMEM accumulator, cast + bias at the end."""
    k = pl.program_id(1)

    @pl.when(k == 0)
    def _():
        acc_ref[...] = jnp.zeros_like(acc_ref)

    acc_ref[...] += _sae_block(x_ref, we_ref, be_ref, thr_ref, wd_ref)

    @pl.when(k == pl.num_programs(1) - 1)
    def _():
        o_ref[...] = (acc_ref[...] + bd_ref[...]).astype(o_ref.dtype)


def jumprelu_sae_forward(x, W_enc, b_enc, threshold, W_dec, b_dec, *,
                         compute_dtype=jnp.bfloat16,
                         tb_max=1024, tn_max=4096,
                         vmem_limit_bytes=None):
    """x: (B, d_model) -> recon: (B, d_model) with dtype x.dtype."""
    B, d_model = x.shape
    d_sae = W_enc.shape[1]
    out_dtype = x.dtype

    if vmem_limit_bytes is None:
        vmem_limit_bytes = _default_vmem_limit_bytes()
    sizing_budget = int(vmem_limit_bytes) - (4 << 20)

    in_item = jnp.dtype(compute_dtype).itemsize
    w_item = in_item
    out_item = jnp.dtype(out_dtype).itemsize
    use_scratch = out_dtype != jnp.float32

    tb = _choose_tb(B, tb_max)
    tn = _choose_tn(d_model, d_sae, tb, tn_max, in_item, w_item, out_item,
                    use_scratch, sizing_budget)

    B_pad = _round_up(B, tb)
    d_sae_pad = _round_up(d_sae, tn)
    pad_s = d_sae_pad - d_sae

    # ---- operand prep (wrapper-side) -------------------------------------
    x_in = x
    if B_pad != B:
        x_in = jnp.pad(x_in, ((0, B_pad - B), (0, 0)))
    x_in = x_in.astype(compute_dtype)

    # Transpose W_enc so its tile is a contiguous (tn, d_model) row block.
    W_enc_t = W_enc.T
    W_dec_p = W_dec
    if pad_s:
        W_enc_t = jnp.pad(W_enc_t, ((0, pad_s), (0, 0)))
        W_dec_p = jnp.pad(W_dec_p, ((0, pad_s), (0, 0)))
    W_enc_t = W_enc_t.astype(compute_dtype)
    W_dec_p = W_dec_p.astype(compute_dtype)

    # Biases / threshold stay f32; ReLU folded into threshold; padded
    # features get threshold=+inf so they can never activate.
    b_enc2 = b_enc.astype(jnp.float32)
    thr2 = jnp.maximum(threshold.astype(jnp.float32), 0.0)
    if pad_s:
        b_enc2 = jnp.pad(b_enc2, (0, pad_s))
        thr2 = jnp.pad(thr2, (0, pad_s), constant_values=jnp.inf)
    b_enc2 = b_enc2.reshape(1, d_sae_pad)
    thr2 = thr2.reshape(1, d_sae_pad)
    b_dec2 = b_dec.astype(jnp.float32).reshape(1, d_model)

    grid = (B_pad // tb, d_sae_pad // tn)      # reduction (d_sae) axis last
    n_btiles = grid[0]

    cost = pl.CostEstimate(
        flops=4 * B_pad * d_model * d_sae_pad,             # encode + decode
        transcendentals=0,
        bytes_accessed=int(
            B_pad * d_model * (in_item + out_item)          # x in + recon out
            + n_btiles * (2 * d_sae_pad * d_model * w_item  # weights / b-tile
                          + 2 * d_sae_pad * 4)              # b_enc + threshold
            + d_model * 4),                                 # b_dec
    )

    kernel = _sae_kernel_scratch if use_scratch else _sae_kernel_accum_out
    scratch_shapes = ([pltpu.VMEM((tb, d_model), jnp.float32)]
                      if use_scratch else [])

    out = pl.pallas_call(
        kernel,
        out_shape=jax.ShapeDtypeStruct((B_pad, d_model), out_dtype),
        grid_spec=pltpu.PrefetchScalarGridSpec(
            num_scalar_prefetch=0,
            grid=grid,
            in_specs=[
                pl.BlockSpec((tb, d_model), lambda i, k: (i, 0)),   # x tile
                pl.BlockSpec((tn, d_model), lambda i, k: (k, 0)),   # W_enc^T rows
                pl.BlockSpec((1, tn), lambda i, k: (0, k)),         # b_enc slice
                pl.BlockSpec((1, tn), lambda i, k: (0, k)),         # thr slice
                pl.BlockSpec((tn, d_model), lambda i, k: (k, 0)),   # W_dec rows
                pl.BlockSpec((1, d_model), lambda i, k: (0, 0)),    # b_dec
            ],
            out_specs=pl.BlockSpec((tb, d_model), lambda i, k: (i, 0)),
            scratch_shapes=scratch_shapes,
        ),
        compiler_params=pltpu.CompilerParams(
            dimension_semantics=("parallel", "arbitrary"),
            vmem_limit_bytes=int(vmem_limit_bytes),
        ),
        cost_estimate=cost,
    )(x_in, W_enc_t, b_enc2, thr2, W_dec_p, b_dec2)

    return out[:B] if B_pad != B else out


def _reference_forward(x, W_enc, b_enc, threshold, W_dec, b_dec,
                       compute_dtype=jnp.float32):
    """Pure-JAX reference matching the PyTorch module; compute_dtype mirrors
    the kernel's MXU input precision (f32 accumulation either way)."""
    cd, f32 = compute_dtype, jnp.float32
    pre = x.astype(cd).astype(f32) @ W_enc.astype(cd).astype(f32) + b_enc
    acts = jnp.where(pre > threshold, jax.nn.relu(pre), 0.0)
    return acts.astype(cd).astype(f32) @ W_dec.astype(cd).astype(f32) + b_dec


if __name__ == "__main__":
    # Small shapes consistent with the module; d_sae=200 exercises the
    # d_sae-padding path (padded to a 128-multiple with +inf thresholds).
    B, d_model, d_sae = 16, 128, 200

    key = jax.random.PRNGKey(0)
    k_x, k_we, k_wd, k_be, k_bd, k_th = jax.random.split(key, 6)

    x = jax.random.normal(k_x, (B, d_model), dtype=jnp.float32)
    W_enc = jax.random.normal(k_we, (d_model, d_sae), dtype=jnp.float32) * 0.1
    W_dec = jax.random.normal(k_wd, (d_sae, d_model), dtype=jnp.float32) * 0.1
    b_enc = jax.random.normal(k_be, (d_sae,), dtype=jnp.float32) * 0.05
    b_dec = jax.random.normal(k_bd, (d_model,), dtype=jnp.float32) * 0.05
    threshold = jnp.abs(jax.random.normal(k_th, (d_sae,), jnp.float32)) * 0.1

    # Exact path: f32 MXU inputs, tn_max=128 -> two d_sae tiles, so the
    # init/accumulate/finalize reduction and the padded tail are exercised.
    recon_f32 = jumprelu_sae_forward(x, W_enc, b_enc, threshold, W_dec, b_dec,
                                     compute_dtype=jnp.float32, tn_max=128)
    recon_f32 = jax.block_until_ready(recon_f32)
    ref_f32 = _reference_forward(x, W_enc, b_enc, threshold, W_dec, b_dec)
    assert recon_f32.shape == (B, d_model)
    assert jnp.allclose(recon_f32, ref_f32, atol=1e-4, rtol=1e-4)

    # Default fast path: bf16 MXU inputs with f32 accumulation.
    recon_bf16 = jumprelu_sae_forward(x, W_enc, b_enc, threshold, W_dec, b_dec)
    recon_bf16 = jax.block_until_ready(recon_bf16)
    ref_bf16 = _reference_forward(x, W_enc, b_enc, threshold, W_dec, b_dec,
                                  compute_dtype=jnp.bfloat16)
    assert recon_bf16.shape == (B, d_model)
    assert jnp.allclose(recon_bf16, ref_bf16, atol=2e-2, rtol=2e-2)

    print("KERNEL_OK")
</pallas_src>

<mosaic_0001>
module attributes {stable_mosaic.version = 11 : i64} {
  func.func @_sae_kernel_accum_out(%arg0: i32, %arg1: i32, %arg2: memref<16x128xf32, #tpu.memory_space<vmem>>, %arg3: memref<128x128xf32, #tpu.memory_space<vmem>>, %arg4: memref<1x128xf32, #tpu.memory_space<vmem>>, %arg5: memref<1x128xf32, #tpu.memory_space<vmem>>, %arg6: memref<128x128xf32, #tpu.memory_space<vmem>>, %arg7: memref<1x128xf32, #tpu.memory_space<vmem>>, %arg8: memref<16x128xf32, #tpu.memory_space<vmem>>) attributes {dimension_semantics = [#tpu.dimension_semantics<parallel>, #tpu.dimension_semantics<arbitrary>], iteration_bounds = array<i64: 1, 2>, scalar_prefetch = 0 : i64, scratch_operands = 0 : i64, tpu.core_type = #tpu.core_type<tc>, window_params = [{transform_indices = @transform_0, window_bounds = array<i64: 16, 128>}, {transform_indices = @transform_1, window_bounds = array<i64: 128, 128>}, {transform_indices = @transform_2, window_bounds = array<i64: 1, 128>}, {transform_indices = @transform_3, window_bounds = array<i64: 1, 128>}, {transform_indices = @transform_4, window_bounds = array<i64: 128, 128>}, {pipeline_mode = #tpu.pipeline_mode<synchronous>, transform_indices = @transform_5, window_bounds = array<i64: 1, 128>}, {transform_indices = @transform_6, window_bounds = array<i64: 16, 128>}]} {
    %c0_i32 = arith.constant 0 : i32
    %0 = arith.cmpi eq, %arg1, %c0_i32 : i32
    %1 = arith.extui %0 : i1 to i32
    %c0_i32_0 = arith.constant 0 : i32
    %2 = arith.cmpi ne, %1, %c0_i32_0 : i32
    scf.if %2 {
      %cst_17 = arith.constant 0.000000e+00 : f32
      %22 = vector.broadcast %cst_17 : f32 to vector<16x128xf32>
      %c0_18 = arith.constant 0 : index
      %c0_19 = arith.constant 0 : index
      %23 = vector.load %arg8[%c0_18, %c0_19] : memref<16x128xf32, #tpu.memory_space<vmem>>, vector<16x128xf32>
      tpu.vector_store %arg8[%c0_18, %c0_19], %22 {strides = array<i32>} : memref<16x128xf32, #tpu.memory_space<vmem>>, vector<16x128xf32>,
    } else {
    }
    %c0 = arith.constant 0 : index
    %c0_1 = arith.constant 0 : index
    %3 = vector.load %arg8[%c0, %c0_1] : memref<16x128xf32, #tpu.memory_space<vmem>>, vector<16x128xf32>
    %c0_2 = arith.constant 0 : index
    %c0_3 = arith.constant 0 : index
    %4 = vector.load %arg2[%c0_2, %c0_3] : memref<16x128xf32, #tpu.memory_space<vmem>>, vector<16x128xf32>
    %c0_4 = arith.constant 0 : index
    %c0_5 = arith.constant 0 : index
    %5 = vector.load %arg3[%c0_4, %c0_5] : memref<128x128xf32, #tpu.memory_space<vmem>>, vector<128x128xf32>
    %cst = arith.constant dense<0.000000e+00> : vector<16x128xf32>
    %6 = tpu.matmul %4, %5, %cst {dimension_numbers = #tpu.dot_dimension_numbers<[1], [1], [0], [0], [0, 0, 1, 0], [], []>} : vector<16x128xf32>, vector<128x128xf32>, vector<16x128xf32> -> vector<16x128xf32>
    %c0_6 = arith.constant 0 : index
    %c0_7 = arith.constant 0 : index
    %7 = vector.load %arg4[%c0_6, %c0_7] : memref<1x128xf32, #tpu.memory_space<vmem>>, vector<1x128xf32>
    %8 = vector.broadcast %7 : vector<1x128xf32> to vector<16x128xf32>
    %9 = arith.addf %6, %8 : vector<16x128xf32>
    %c0_8 = arith.constant 0 : index
    %c0_9 = arith.constant 0 : index
    %10 = vector.load %arg5[%c0_8, %c0_9] : memref<1x128xf32, #tpu.memory_space<vmem>>, vector<1x128xf32>
    %11 = vector.broadcast %10 : vector<1x128xf32> to vector<16x128xf32>
    %12 = arith.cmpf ogt, %9, %11 : vector<16x128xf32>
    %cst_10 = arith.constant 0.000000e+00 : f32
    %13 = vector.broadcast %cst_10 : f32 to vector<16x128xf32>
    %14 = arith.select %12, %9, %13 : vector<16x128xi1>, vector<16x128xf32>
    %c0_11 = arith.constant 0 : index
    %c0_12 = arith.constant 0 : index
    %15 = vector.load %arg6[%c0_11, %c0_12] : memref<128x128xf32, #tpu.memory_space<vmem>>, vector<128x128xf32>
    %cst_13 = arith.constant dense<0.000000e+00> : vector<16x128xf32>
    %16 = tpu.matmul %14, %15, %cst_13 {dimension_numbers = #tpu.dot_dimension_numbers<[1], [0], [0], [1], [0, 0, 1, 1], [], []>} : vector<16x128xf32>, vector<128x128xf32>, vector<16x128xf32> -> vector<16x128xf32>
    %17 = arith.addf %3, %16 : vector<16x128xf32>
    %c0_14 = arith.constant 0 : index
    %c0_15 = arith.constant 0 : index
    %18 = vector.load %arg8[%c0_14, %c0_15] : memref<16x128xf32, #tpu.memory_space<vmem>>, vector<16x128xf32>
    tpu.vector_store %arg8[%c0_14, %c0_15], %17 {strides = array<i32>} : memref<16x128xf32, #tpu.memory_space<vmem>>, vector<16x128xf32>,
    %c1_i32 = arith.constant 1 : i32
    %19 = arith.cmpi eq, %arg1, %c1_i32 : i32
    %20 = arith.extui %19 : i1 to i32
    %c0_i32_16 = arith.constant 0 : i32
    %21 = arith.cmpi ne, %20, %c0_i32_16 : i32
    scf.if %21 {
      %c0_17 = arith.constant 0 : index
      %c0_18 = arith.constant 0 : index
      %22 = vector.load %arg8[%c0_17, %c0_18] : memref<16x128xf32, #tpu.memory_space<vmem>>, vector<16x128xf32>
      %c0_19 = arith.constant 0 : index
      %c0_20 = arith.constant 0 : index
      %23 = vector.load %arg7[%c0_19, %c0_20] : memref<1x128xf32, #tpu.memory_space<vmem>>, vector<1x128xf32>
      %24 = vector.broadcast %23 : vector<1x128xf32> to vector<16x128xf32>
      %25 = arith.addf %22, %24 : vector<16x128xf32>
      %c0_21 = arith.constant 0 : index
      %c0_22 = arith.constant 0 : index
      %26 = vector.load %arg8[%c0_21, %c0_22] : memref<16x128xf32, #tpu.memory_space<vmem>>, vector<16x128xf32>
      tpu.vector_store %arg8[%c0_21, %c0_22], %25 {strides = array<i32>} : memref<16x128xf32, #tpu.memory_space<vmem>>, vector<16x128xf32>,
    } else {
    }
    return
  }
  func.func @transform_0(%arg0: i32, %arg1: i32) -> (i32, i32) {
    %c0_i32 = arith.constant 0 : i32
    %c0_i32_0 = arith.constant 0 : i32
    return %arg0, %c0_i32 : i32, i32
  }
  func.func @transform_1(%arg0: i32, %arg1: i32) -> (i32, i32) {
    %c0_i32 = arith.constant 0 : i32
    %c0_i32_0 = arith.constant 0 : i32
    return %arg1, %c0_i32 : i32, i32
  }
  func.func @transform_2(%arg0: i32, %arg1: i32) -> (i32, i32) {
    %c0_i32 = arith.constant 0 : i32
    %c0_i32_0 = arith.constant 0 : i32
    return %c0_i32, %arg1 : i32, i32
  }
  func.func @transform_3(%arg0: i32, %arg1: i32) -> (i32, i32) {
    %c0_i32 = arith.constant 0 : i32
    %c0_i32_0 = arith.constant 0 : i32
    return %c0_i32, %arg1 : i32, i32
  }
  func.func @transform_4(%arg0: i32, %arg1: i32) -> (i32, i32) {
    %c0_i32 = arith.constant 0 : i32
    %c0_i32_0 = arith.constant 0 : i32
    return %arg1, %c0_i32 : i32, i32
  }
  func.func @transform_5(%arg0: i32, %arg1: i32) -> (i32, i32) {
    %c0_i32 = arith.constant 0 : i32
    %c0_i32_0 = arith.constant 0 : i32
    %c0_i32_1 = arith.constant 0 : i32
    return %c0_i32, %c0_i32_0 : i32, i32
  }
  func.func @transform_6(%arg0: i32, %arg1: i32) -> (i32, i32) {
    %c0_i32 = arith.constant 0 : i32
    %c0_i32_0 = arith.constant 0 : i32
    return %arg0, %c0_i32 : i32, i32
  }
}

</mosaic_0001>

<bundles_post_ra>
// kernel: tpu_custom_call.1
= control target key start
LH: loop header
LB: loop body
LE: loop exit
PB: predicated region body
PF: predicated region fallthrough
CT: control target
= control target key end

     0   :  { %11 = vsyncpa [#allocation3], 0  ;;  %s1375_s0 = inlined_call_operand.hbm [shape: f32[16,128], index: 0, kind: input, shape index: {}]   ;;  %s1376_s1 = inlined_call_operand.hbm [shape: f32[256,128], index: 1, kind: input, shape index: {}]   ;;  %s1377_s2 = inlined_call_operand.vmem [shape: f32[1,256], index: 2, kind: input, shape index: {}]   ;;  %s1378_s3 = inlined_call_operand.vmem [shape: f32[1,256], index: 3, kind: input, shape index: {}]   ;;  %s1379_s4 = inlined_call_operand.hbm [shape: f32[256,128], index: 4, kind: input, shape index: {}]   ;;  %s1380_s5 = inlined_call_operand.vmem [shape: f32[1,128], index: 5, kind: input, shape index: {}]   ;;  %s1381_s6 = inlined_call_operand.hbm [shape: f32[16,128], index: 6, kind: output, shape index: {}]  }
   0x1   :  { %12 = vsyncpa [#allocation6], 0 }
   0x2   :  { %14 = vsyncpa [#allocation6 + $0x1], 0 }
   0x3   :  { %15 = vsyncpa [#allocation4], 0  ;;  %s1149_s21 = smov 0   ;;  %s1151_s22 = smov 0  }
   0x4   :  { %s1153_s23 = smov 0   ;;  %s1155_s24 = smov 0  }
   0x5   :  { %s1157_s25 = smov 0   ;;  %s1159_s26 = smov 0  }
   0x6 LB: > { %s30_s27 = sadd.s32 1, %s1099_s25  ;;  %s66_s28 = sadd.s32 1, %s1091_s23  ;;  %s1103_s26 = sphi %s1159_s26, %s21_s26   ;;  %s1099_s25 = sphi %s1157_s25, %s1390_s25   ;;  %s1095_s24 = sphi %s1155_s24, %s1389_s24   ;;  %s1091_s23 = sphi %s1153_s23, %s1388_s23   ;;  %s1087_s22 = sphi %s1151_s22, %s1387_s22   ;;  %s1083_s21 = sphi %s1149_s21, %s1386_s21  }
   0x7   : > { %p31_p0 = scmp.ge.s32.totalorder %s30_s27, 2  ;;  %p73_p1 = scmp.ne.s32.totalorder %s1091_s23, %s1087_s22 }
   0x8   : > { %p74_p2 = scmp.eq.s32.totalorder %s1103_s26, 0  ;;  %p880_p5 = scmp.lt.s32.totalorder %s1103_s26, 2 }
   0x9   : > { %s1392_s27 = smov (%p31_p0, %s30_s27), 0  ;;  %s247_s7 = sand.u32 1, %s1103_s26  }
   0xa   : > { %p1186_p3 = por %p74_p2, %p73_p1  ;;  %s63_s30 = ssub.s32 %s1099_s25, %s1392_s27 }
   0xb   : > { %p64_p4 = scmp.eq.s32.totalorder %s63_s30, 0  ;;  %s249_s8 = sand.u32 1, %s1091_s23  }
   0xc   : > { %s727_s10 = sshll.u32 %s249_s8, 7  ;;  %s748_s11 = sshll.u32 %s1099_s25, 11 }
   0xd   : > { %s1196_s9 = scalar_select %p64_p4, %s1091_s23, %s66_s28  }
   0xe   : > { %s1202_s14 = scalar_lea.hbm %s1376_s1, %s748_s11  ;;  %s251_s15 = scalar_lea.vmem [#allocation5], %s727_s10 }
   0xf   : > { %s258_s16 = sshll.u32 %s251_s15, 4  ;;  %p1206_p6 = pnand %p880_p5, %p1186_p3  ;;  %s259_s16 = int_to_ptr.vmem [resolvable:$true] %s258_s16 }
  0x10   : > { %s1213_s20 = scalar_lea.hbm %s1379_s4, %s748_s11  ;;  %s284_s28 = scalar_lea.vmem [#allocation7], %s727_s10 }
  0x11   : > { %s291_s30 = sshll.u32 %s284_s28, 4  ;;  %s1215_s8 = scalar_lea.sflag [#allocation6], %s247_s7  ;;  %s292_s30 = int_to_ptr.vmem [resolvable:$true] %s291_s30 }
  0x12   : > { %p941_p7 = pneg %p1206_p6  ;;  %s952_s12 = scalar_lea.vmem %s259_s16, 2048 }
  0x13   : > { %p953_p8 = scmp.ne.s32.totalorder %s259_s16, %s952_s12  ;;  %s1105_s29 = smov [#allocation5]  }
  0x14   : > { %s957_s13 = sshll.u32 %s1105_s29, 4  ;;  %s958_s13 = int_to_ptr.vmem [resolvable:$false] %s957_s13 }
  0x15   : > { %p955_p9 = pnand %p953_p8, %p941_p7  ;;  %s959_s15 = scalar_lea.vmem %s958_s13, 4096 }
  0x16   : > { %p960_p11 = scmp.lt.s32.totalorder %s259_s16, %s958_s13  ;;  %p961_p12 = scmp.lt.s32.totalorder %s959_s15, %s952_s12 }
  0x17   : > { %p956_p10 = pneg %p955_p9 }
  0x18   : > { %p962_p13 = por %p961_p12, %p960_p11 }
  0x1a   : > { %p963_p0 = pnand %p962_p13, %p956_p10 }
  0x1c   : > { %966 = shalt.err (!%p963_p0)
}
  0x1d   : > { %s1106_s10 = smov 128   ;;  %s1107_s7 = smov 8  }
  0x1e   : > { %875 = dma.hbm_to_vmem [thread:$0]  (!%p1206_p6), %s1202_s14, 2048, %s259_s16, %s1215_s8, %s1106_s10, %s1106_s10, %s1107_s7  }
  0x1f   : > { %s1230_s11 = sadd.s32 4294967295, %s1103_s26   ;;  %p79_p1 = scmp.ne.s32.totalorder %s1087_s22, %s1083_s21 }
  0x20   : > { %p80_p2 = scmp.eq.s32.totalorder %s1230_s11, 0  ;;  %p724_p3 = scmp.ge.s32.totalorder %s1103_s26, 1 }
  0x21   : > { %p215_p4 = scmp.lt.s32.totalorder %s1103_s26, 3  ;;  %s1108_s14 = smov [#allocation2]  }
  0x22   : > { %p1239_p5 = por %p80_p2, %p79_p1  ;;  %s230_s16 = sshll.u32 %s1108_s14, 4  ;;  %s231_s16 = int_to_ptr.vmem [resolvable:$true] %s230_s16 }
  0x23   : > { %p1243_p8 = pnand %p724_p3, %p215_p4  ;;  %s980_s28 = scalar_lea.vmem %s292_s30, 2048 }
  0x24   : > { %p981_p10 = scmp.ne.s32.totalorder %s292_s30, %s980_s28  ;;  %s1109_s21 = smov [#allocation7]  }
  0x25   : > { %p868_p9 = pneg %p1243_p8  ;;  %s985_s12 = sshll.u32 %s1109_s21, 4  ;;  %s986_s12 = int_to_ptr.vmem [resolvable:$false] %s985_s12 }
  0x26   : > { %p983_p11 = pnand %p981_p10, %p941_p7  ;;  %s987_s29 = scalar_lea.vmem %s986_s12, 4096 }
  0x27   : > { %p988_p13 = scmp.lt.s32.totalorder %s292_s30, %s986_s12  ;;  %p989_p0 = scmp.lt.s32.totalorder %s987_s29, %s980_s28 }
  0x28   : > { %p984_p12 = pneg %p983_p11 }
  0x29   : > { %p990_p1 = por %p989_p0, %p988_p13 }
  0x2b   : > { %p991_p3 = pnand %p990_p1, %p984_p12 }
  0x2d   : > { %994 = shalt.err (!%p991_p3)
}
  0x2e   : > { %878 = dma.hbm_to_vmem [thread:$0]  (!%p1206_p6), %s1213_s20, 2048, %s292_s30, %s1215_s8, %s1106_s10, %s1106_s10, %s1107_s7  }
  0x2f   : > { %p869_p7 = pnand %p868_p9, %p80_p2  ;;  %s1006_s13 = scalar_lea.vmem %s231_s16, 256 }
  0x30   : > { %p1007_p10 = scmp.ne.s32.totalorder %s231_s16, %s1006_s13  ;;  %p1014_p13 = scmp.lt.s32.totalorder %s231_s16, %s231_s16 }
  0x31   : > { %p997_p4 = pneg %p869_p7  ;;  %p1015_p0 = scmp.lt.s32.totalorder %s1006_s13, %s1006_s13 }
  0x33   : > { %p1009_p11 = pnand %p1007_p10, %p997_p4  ;;  %p1016_p1 = por %p1015_p0, %p1014_p13 }
  0x35   : > { %p1010_p12 = pneg %p1009_p11 }
  0x37   : > { %p1017_p3 = pnand %p1016_p1, %p1010_p12 }
  0x39   : > { %1020 = shalt.err (!%p1017_p3)
}
  0x3a   : > { %871 = dma.hbm_to_vmem [thread:$0]  (!%p869_p7), %s1375_s0, 256, %s231_s16, [#allocation3], %s1106_s10, %s1106_s10, %s1107_s7  }
  0x3b   : > { %303 = sbr.rel (%p1243_p8) target bundleno = 567 (0x237), region = 44 }
  0x40   : > { %1070 = dma.done.wait (%p80_p2), [#allocation3], 256  }
  0x41   : > { %1072 = vsyncadd (%p80_p2), [#allocation3], 4294967040  ;;  %s309_s30 = sand.u32 1, %s1230_s11   ;;  %s311_s8 = sand.u32 1, %s1087_s22  }
  0x42   : > { %s735_s15 = sshll.u32 %s311_s8, 7  ;;  %s310_s14 = scalar_lea.sflag [#allocation6], %s309_s30 }
  0x43   : > { %s1278_s28 = scalar_lea.vmem [#allocation5], %s735_s15 }
  0x44   : > { %1074 = dma.done.wait (%p1239_p5), %s310_s14, 4096  }
  0x45   : > { %1076 = vsyncadd (%p1239_p5), %s310_s14, 4294963200  ;;  %p359_p6 = scmp.lt.s32.totalorder %s1095_s24, 1  ;;  %s1296_s13 = scalar_lea.vmem [#allocation7], %s735_s15 }
  0x46   : > { %p737_p2 = scmp.ne.s32.totalorder %s1095_s24, 0 }
  0x47   : > { %s1286_s10 = scalar_select %p359_p6, %s1095_s24, 1 }
  0x48   : > { %370 = sbr.rel (%p737_p2) target bundleno = 79 (0x4f), region = 60 }
  0x49   : > { %s361_s16 = scalar_lea.vmem %s1377_s2, %s1286_s10  ;;  %s364_s29 = scalar_lea.vmem %s1378_s3, %s1286_s10 }
  0x4d   : > { %v1110_v0 = vmov 0.0  }
  0x4e   : > { %371 = vst [vmem:[#allocation8] sm:$0xff] %v1110_v0  ;;  %372 = vst [vmem:[#allocation8 + $0x8] sm:$0xff] %v1110_v0 }
  0x4f PF: > { %v392_v1 = vld [vmem:[%s1278_s28 + $0x78] sm:$0xff]  ;;  %v391_v2 = vld [vmem:[%s1278_s28 + $0x70] sm:$0xff]  ;;  %v390_v3 = vld [vmem:[%s1278_s28 + $0x68] sm:$0xff]  ;;  %p742_p5 = scmp.ne.s32.totalorder %s1095_s24, 1 }
  0x50   : > { %786 = vmatprep.subr.mxu0 %v392_v1  ;;  %v375_v4 = vld [vmem:[#allocation2] sm:$0xff]  ;;  %v501_v5 = vld [vmem:[%s1296_s13 + $0x78] sm:$0xff]  ;;  %v389_v7 = vld [vmem:[%s1278_s28 + $0x60] sm:$0xff] }
  0x51   : > { %787 = vmatpush3.xpose.msra.mxu0 %v392_v1  ;;  %818 = vmatprep.mubr.f32.mxu0 %v375_v4  ;;  %v500_v6 = vld [vmem:[%s1296_s13 + $0x70] sm:$0xff]  ;;  %v499_v8 = vld [vmem:[%s1296_s13 + $0x68] sm:$0xff]  ;;  %v498_v9 = vld [vmem:[%s1296_s13 + $0x60] sm:$0xff] }
  0x52   : > { %788 = vmatprep.subr.mxu0 %v391_v2  ;;  %821 = vmatprep.subr.mxu1 %v501_v5  ;;  %v388_v10 = vld [vmem:[%s1278_s28 + $0x58] sm:$0xff]  ;;  %v496_v12 = vld [vmem:[%s1296_s13 + $0x50] sm:$0xff]  ;;  %v495_v14 = vld [vmem:[%s1296_s13 + $0x48] sm:$0xff] }
  0x53   : > { %822 = vmatpush3.msra.mxu1 %v501_v5  ;;  %v497_v11 = vld [vmem:[%s1296_s13 + $0x58] sm:$0xff]  ;;  %v387_v13 = vld [vmem:[%s1278_s28 + $0x50] sm:$0xff]  ;;  %v494_v15 = vld [vmem:[%s1296_s13 + $0x40] sm:$0xff] }
  0x54   : > { %823 = vmatprep.subr.mxu1 %v500_v6  ;;  %v386_v16 = vld [vmem:[%s1278_s28 + $0x48] sm:$0xff]  ;;  %v493_v17 = vld [vmem:[%s1296_s13 + $0x38] sm:$0xff]  ;;  %v492_v18 = vld [vmem:[%s1296_s13 + $0x30] sm:$0xff] }
  0x55   : > { %789 = vmatpush3.xpose.msra.mxu0 %v391_v2  ;;  %824 = vmatpush3.msra.mxu1 %v500_v6  ;;  %v385_v19 = vld [vmem:[%s1278_s28 + $0x40] sm:$0xff]  ;;  %v491_v20 = vld [vmem:[%s1296_s13 + $0x28] sm:$0xff]  ;;  %v384_v22 = vld [vmem:[%s1278_s28 + $0x38] sm:$0xff] }
  0x56   : > { %790 = vmatprep.subr.mxu0 %v390_v3  ;;  %825 = vmatprep.subr.mxu1 %v499_v8  ;;  %v490_v21 = vld [vmem:[%s1296_s13 + $0x20] sm:$0xff]  ;;  %v489_v23 = vld [vmem:[%s1296_s13 + $0x18] sm:$0xff]  ;;  %v383_v24 = vld [vmem:[%s1278_s28 + $0x30] sm:$0xff] }
  0x57   : > { %826 = vmatpush3.msra.mxu1 %v499_v8  ;;  %v382_v25 = vld [vmem:[%s1278_s28 + $0x28] sm:$0xff]  ;;  %v381_v26 = vld [vmem:[%s1278_s28 + $0x20] sm:$0xff]  ;;  %v380_v27 = vld [vmem:[%s1278_s28 + $0x18] sm:$0xff] }
  0x58   : > { %827 = vmatprep.subr.mxu1 %v498_v9  ;;  %v379_v28 = vld [vmem:[%s1278_s28 + $0x10] sm:$0xff]  ;;  %v378_v29 = vld [vmem:[%s1278_s28 + $0x8] sm:$0xff]  ;;  %v377_v30 = vld [vmem:[%s1278_s28] sm:$0xff] }
  0x59   : > { %791 = vmatpush3.xpose.msra.mxu0 %v390_v3  ;;  %828 = vmatpush3.msra.mxu1 %v498_v9  ;;  %v376_v31 = vld [vmem:[#allocation2 + $0x8] sm:$0xff]  ;;  %v488_v32 = vld [vmem:[%s1296_s13 + $0x10] sm:$0xff]  ;;  %v487_v33 = vld [vmem:[%s1296_s13 + $0x8] sm:$0xff] }
  0x5a   : > { %792 = vmatprep.subr.mxu0 %v389_v7  ;;  %829 = vmatprep.subr.mxu1 %v497_v11  ;;  %v486_v34 = vld [vmem:[%s1296_s13] sm:$0xff]  ;;  %v738_v35 = vld [vmem:[%s361_s16] ss:$0 sm:$0xff]  ;;  %v374_v41 = vld [vmem:[#allocation8 + $0x8] sm:$0xff] }
  0x5b   : > { %830 = vmatpush3.msra.mxu1 %v497_v11  ;;  %v739_v40 = vld [vmem:[%s364_s29] ss:$0 sm:$0xff]  ;;  %v373_v43 = vld [vmem:[#allocation8] sm:$0xff] }
  0x5c   : > { %831 = vmatprep.subr.mxu1 %v496_v12 }
  0x5d   : > { %793 = vmatpush3.xpose.msra.mxu0 %v389_v7  ;;  %832 = vmatpush3.msra.mxu1 %v496_v12 }
  0x5e   : > { %794 = vmatprep.subr.mxu0 %v388_v10  ;;  %833 = vmatprep.subr.mxu1 %v495_v14 }
  0x5f   : > { %834 = vmatpush3.msra.mxu1 %v495_v14 }
  0x60   : > { %835 = vmatprep.subr.mxu1 %v494_v15 }
  0x61   : > { %795 = vmatpush3.xpose.msra.mxu0 %v388_v10  ;;  %836 = vmatpush3.msra.mxu1 %v494_v15 }
  0x62   : > { %796 = vmatprep.subr.mxu0 %v387_v13  ;;  %837 = vmatprep.subr.mxu1 %v493_v17 }
  0x63   : > { %838 = vmatpush3.msra.mxu1 %v493_v17 }
  0x64   : > { %839 = vmatprep.subr.mxu1 %v492_v18 }
  0x65   : > { %797 = vmatpush3.xpose.msra.mxu0 %v387_v13  ;;  %840 = vmatpush3.msra.mxu1 %v492_v18 }
  0x66   : > { %798 = vmatprep.subr.mxu0 %v386_v16  ;;  %841 = vmatprep.subr.mxu1 %v491_v20 }
  0x67   : > { %842 = vmatpush3.msra.mxu1 %v491_v20 }
  0x68   : > { %843 = vmatprep.subr.mxu1 %v490_v21 }
  0x69   : > { %799 = vmatpush3.xpose.msra.mxu0 %v386_v16  ;;  %844 = vmatpush3.msra.mxu1 %v490_v21 }
  0x6a   : > { %800 = vmatprep.subr.mxu0 %v385_v19  ;;  %845 = vmatprep.subr.mxu1 %v489_v23 }
  0x6b   : > { %846 = vmatpush3.msra.mxu1 %v489_v23 }
  0x6c   : > { %847 = vmatprep.subr.mxu1 %v488_v32 }
  0x6d   : > { %801 = vmatpush3.xpose.msra.mxu0 %v385_v19  ;;  %848 = vmatpush3.msra.mxu1 %v488_v32 }
  0x6e   : > { %802 = vmatprep.subr.mxu0 %v384_v22  ;;  %849 = vmatprep.subr.mxu1 %v487_v33 }
  0x6f   : > { %850 = vmatpush3.msra.mxu1 %v487_v33 }
  0x70   : > { %851 = vmatprep.subr.mxu1 %v486_v34 }
  0x71   : > { %803 = vmatpush3.xpose.msra.mxu0 %v384_v22  ;;  %852 = vmatpush3.msra.mxu1 %v486_v34 }
  0x72   : > { %804 = vmatprep.subr.mxu0 %v383_v24 }
  0x75   : > { %805 = vmatpush3.xpose.msra.mxu0 %v383_v24 }
  0x76   : > { %806 = vmatprep.subr.mxu0 %v382_v25 }
  0x79   : > { %807 = vmatpush3.xpose.msra.mxu0 %v382_v25 }
  0x7a   : > { %808 = vmatprep.subr.mxu0 %v381_v26 }
  0x7d   : > { %809 = vmatpush3.xpose.msra.mxu0 %v381_v26 }
  0x7e   : > { %810 = vmatprep.subr.mxu0 %v380_v27 }
  0x81   : > { %811 = vmatpush3.xpose.msra.mxu0 %v380_v27 }
  0x82   : > { %812 = vmatprep.subr.mxu0 %v379_v28 }
  0x85   : > { %813 = vmatpush3.xpose.msra.mxu0 %v379_v28 }
  0x86   : > { %814 = vmatprep.subr.mxu0 %v378_v29 }
  0x89   : > { %815 = vmatpush3.xpose.msra.mxu0 %v378_v29 }
  0x8a   : > { %816 = vmatprep.subr.mxu0 %v377_v30 }
  0x8d   : > { %817 = vmatpush3.xpose.msra.mxu0 %v377_v30 }
  0x90   : > { %819 = vmatmul.mubr.f32.vlgmr.msra.gmra.mxu0 %v376_v31 }
 0x150   : > { %v820_v36 = vpop.f32.mrf.mxu0 }
 0x151   : > { %v472_v37 = vadd.f32 %v820_v36, %v738_v35 }
 0x152   : > { %v466_v38 = vpop.f32.mrf.mxu0 }
 0x153   : > { %v467_v39 = vadd.f32 %v738_v35, %v466_v38  ;;  %vm483_vm1 = vcmp.gt.f32.partialorder %v472_v37, %v739_v40 }
 0x155   : > { %vm482_vm0 = vcmp.gt.f32.partialorder %v467_v39, %v739_v40 }
 0x156   : > { %853 = vmatprep.mubr.msk.f32.mxu1 %vm482_vm0, %v467_v39 }
 0x157   : > { %854 = vmatmul.mubr.msk.f32.vlgmr.msra.gmra.mxu1 %vm483_vm1, %v472_v37 }
 0x217   : > { %v855_v42 = vpop.f32.mrf.mxu1 }
 0x218   : > { %v578_v44 = vadd.f32 %v855_v42, %v374_v41  ;;  %584 = sbr.rel (%p742_p5) target bundleno = 551 (0x227), region = 64 }
 0x219   : > { %v568_v45 = vpop.f32.mrf.mxu1 }
 0x21a   : > { %580 = vst [vmem:[#allocation8 + $0x8] sm:$0xff] %v578_v44  ;;  %v577_v46 = vadd.f32 %v568_v45, %v373_v43 }
 0x21c   : > { %579 = vst [vmem:[#allocation8] sm:$0xff] %v577_v46 }
 0x21d   : > { %v743_v48 = vld [vmem:[%s1380_s5] ss:$0 sm:$0xff] }
 0x221   : > { %v586_v49 = vld [vmem:[#allocation8 + $0x8] sm:$0xff] }
 0x222   : > { %v595_v51 = vadd.f32 %v743_v48, %v586_v49 }
 0x223   : > { %v585_v47 = vld [vmem:[#allocation8] sm:$0xff] }
 0x224   : > { %v594_v50 = vadd.f32 %v743_v48, %v585_v47  ;;  %597 = vst [vmem:[#allocation8 + $0x8] sm:$0xff] %v595_v51 }
 0x226   : > { %596 = vst [vmem:[#allocation8] sm:$0xff] %v594_v50 }
 0x227 PF: > { %p882_p8 = scmp.eq.s32.totalorder %s1230_s11, 1  ;;  %s1111_s14 = smov [#allocation8]  }
 0x228   : > { %s607_s28 = sshll.u32 %s1111_s14, 4  ;;  %s608_s28 = int_to_ptr.vmem [resolvable:$true] %s607_s28 }
 0x229   : > { %s1021_s10 = scalar_lea.vmem %s608_s28, 256  ;;  %p1028_p10 = scmp.lt.s32.totalorder %s608_s28, %s608_s28 }
 0x22a   : > { %p1022_p9 = scmp.ne.s32.totalorder %s608_s28, %s1021_s10  ;;  %p1029_p11 = scmp.lt.s32.totalorder %s1021_s10, %s1021_s10 }
 0x22c   : > { %p1023_p7 = pnand %p1022_p9, %p882_p8  ;;  %p1030_p12 = por %p1029_p11, %p1028_p10 }
 0x22e   : > { %p1024_p4 = pneg %p1023_p7 }
 0x230   : > { %p1031_p13 = pnand %p1030_p12, %p1024_p4 }
 0x232   : > { %1034 = shalt.err (!%p1031_p13)
}
 0x233   : > { %s1112_s24 = smov 128   ;;  %s1113_s7 = smov 8  }
 0x234   : > { %865 = dma.vmem_to_hbm [thread:$0]  (%p882_p8), %s608_s28, 256, %s1381_s6, [#allocation4], %s1112_s24, %s1112_s24, %s1113_s7  }
 0x235   : > { %1078 = dma.done.wait (%p882_p8), [#allocation4], 256  }
 0x236   : > { %1080 = vsyncadd (%p882_p8), [#allocation4], 4294967040 }
 0x237 PF: > { %s21_s26 = sadd.s32 1, %s1103_s26   ;;  %s1386_s21 = smov %s1087_s22 }
 0x238   : > { %p18_p0 = scmp.ge.s32.totalorder %s21_s26, 4   ;;  %s1387_s22 = smov %s1091_s23 }
 0x239   : > { %s1388_s23 = smov %s1196_s9  ;;  %s1389_s24 = smov %s1099_s25 }
 0x23a   : > { %s1390_s25 = smov %s1392_s27  ;;  %20 = sbr.rel (!%p18_p0) target bundleno = 6 (0x6), region = 113 }
 0x23f   :  { %623 = vsyncpa [#allocation3], 1 }
 0x240   :  { %625 = vsyncpa [#allocation3 + $0x1], 1 }
 0x241   :  { %626 = vsyncpa [#allocation6], 1 }
 0x242   :  { %628 = vsyncpa [#allocation6 + $0x1], 1 }
 0x243   :  { %629 = vsyncpa [#allocation4], 1 }
 0x244   :  { %631 = vsyncpa [#allocation4 + $0x1], 1 }

</bundles_post_ra>
